<compile_context>
chip_gen: v7x
topology: tpu7x:2x2x1
jax: 0.10.0
libtpu: 0.0.40
codegen_flags: <defaults>
</compile_context>

<pallas_src>
import functools

import jax
import jax.numpy as jnp
from jax.experimental import pallas as pl
from jax.experimental.pallas import tpu as pltpu


def _round_up(x: int, m: int) -> int:
    return ((x + m - 1) // m) * m


def _make_kernel(use_mxu_l1: bool, bf16_epilogue: bool):
    """Fused 3-layer MLP kernel on one row-tile of points.

    x_ref : (TM, 3)     f32   w1: (3, 128) f32   b1: (1, 128) f32
    w2    : (128, 512)  bf16  b2: (1, 512) f32
    w3    : (512, Dp)   bf16  b3: (1, Dp)  f32
    o_ref : (TM, Dp)    f32
    """

    def kernel(x_ref, w1_ref, b1_ref, w2_ref, b2_ref, w3_ref, b3_ref, o_ref):
        if use_mxu_l1:
            # v6e/v7x: put the K=3 layer on the MXU (it has slack there) and
            # keep the VPU free.  f32 operands: the padded K<=256 pass is
            # negligible either way and avoids any small-K bf16 packing issues.
            h1 = jnp.dot(x_ref[...], w1_ref[...],
                         preferred_element_type=jnp.float32)
        else:
            # v5e: MXU is the binding unit, so do layer 1 as 3 broadcast FMAs
            # on the VPU instead of an extra MXU pass.
            x = x_ref[...].astype(jnp.float32)
            w1 = w1_ref[...]
            h1 = (x[:, 0:1] * w1[0:1, :]
                  + x[:, 1:2] * w1[1:2, :]
                  + x[:, 2:3] * w1[2:3, :])

        if bf16_epilogue:
            # v6e/v7x: bias+ReLU packed in bf16 on the VALU (2 elems/lane/op);
            # directly yields the bf16 operand for the next MXU pass.
            h1 = jnp.maximum(h1.astype(jnp.bfloat16)
                             + b1_ref[...].astype(jnp.bfloat16), 0)
            h2 = jnp.dot(h1, w2_ref[...], preferred_element_type=jnp.float32)
            h2 = jnp.maximum(h2.astype(jnp.bfloat16)
                             + b2_ref[...].astype(jnp.bfloat16), 0)
        else:
            # v5e: no bf16 VALU -> keep epilogues in f32, cast only for the MXU.
            h1 = jnp.maximum(h1 + b1_ref[...], 0.0).astype(jnp.bfloat16)
            h2 = jnp.dot(h1, w2_ref[...], preferred_element_type=jnp.float32)
            h2 = jnp.maximum(h2 + b2_ref[...], 0.0).astype(jnp.bfloat16)

        out = jnp.dot(h2, w3_ref[...], preferred_element_type=jnp.float32)
        o_ref[...] = (out + b3_ref[...]).astype(o_ref.dtype)

    return kernel


@functools.lru_cache(maxsize=1)
def _chip_flags():
    """Static per-generation kernel choices (safe defaults if kind unknown)."""
    kind = ""
    try:
        kind = jax.devices()[0].device_kind.lower()
    except Exception:
        pass
    legacy = any(tag in kind for tag in ("v2", "v3", "v4", "v5"))
    use_mxu_l1 = not legacy        # v6e/v7x: layer 1 on the (idle) MXU
    bf16_epilogue = not legacy     # v6e/v7x: bf16 VALU bias+ReLU
    min_grid_steps = 2 if "v7" in kind else 1   # shard across v7x's 2 TCs
    return use_mxu_l1, bf16_epilogue, min_grid_steps


@functools.partial(
    jax.jit,
    static_argnames=("out_dim", "tile_m", "use_mxu_l1", "bf16_epilogue",
                     "min_grid_steps"))
def _projector_impl(points, w1, b1, w2, b2, w3, b3, *, out_dim, tile_m,
                    use_mxu_l1, bf16_epilogue, min_grid_steps):
    B, N, C = points.shape
    assert C == 3
    D_pad = w3.shape[1]          # already padded to a multiple of 128
    M = B * N
    x = points.reshape(M, 3)

    # Row tile: large (amortizes ~0.35us/step, keeps chained MXU passes full),
    # split >=2 ways on v7x so both TensorCores are used (>=512 rows/core),
    # full-extent for small inputs (always a legal block shape).
    tm = tile_m
    if min_grid_steps > 1:
        per_core = _round_up(-(-M // min_grid_steps), 8)
        tm = min(tm, max(512, per_core))
    if tm >= M:
        tm = M
    grid = ((M + tm - 1) // tm,)

    flops = 2 * M * (3 * 128 + 128 * 512 + 512 * D_pad)
    bytes_accessed = (M * (3 + D_pad) * 4
                      + (w2.size + w3.size) * 2
                      + (w1.size + b1.size + b2.size + b3.size) * 4)

    out = pl.pallas_call(
        _make_kernel(use_mxu_l1, bf16_epilogue),
        out_shape=jax.ShapeDtypeStruct((M, D_pad), points.dtype),
        grid_spec=pltpu.PrefetchScalarGridSpec(
            num_scalar_prefetch=0,
            grid=grid,
            in_specs=[
                pl.BlockSpec((tm, 3), lambda i: (i, 0)),        # x tile
                pl.BlockSpec((3, 128), lambda i: (0, 0)),       # w1 (resident)
                pl.BlockSpec((1, 128), lambda i: (0, 0)),       # b1
                pl.BlockSpec((128, 512), lambda i: (0, 0)),     # w2 (bf16)
                pl.BlockSpec((1, 512), lambda i: (0, 0)),       # b2
                pl.BlockSpec((512, D_pad), lambda i: (0, 0)),   # w3 (bf16)
                pl.BlockSpec((1, D_pad), lambda i: (0, 0)),     # b3
            ],
            out_specs=pl.BlockSpec((tm, D_pad), lambda i: (i, 0)),
        ),
        compiler_params=pltpu.CompilerParams(
            dimension_semantics=("parallel",),
            vmem_limit_bytes=32 * 1024 * 1024,
        ),
        cost_estimate=pl.CostEstimate(
            flops=flops, transcendentals=0, bytes_accessed=bytes_accessed),
    )(x, w1, b1, w2, b2, w3, b3)

    if D_pad != out_dim:
        out = out[:, :out_dim]
    return out.reshape(B, N, out_dim)


def point_cloud_projector(points, prepared_params, out_dim, tile_m=1024):
    """points: (B, N, 3) f32, prepared_params from prepare_params().
    Returns (B, N, out_dim) f32."""
    use_mxu_l1, bf16_epilogue, min_grid_steps = _chip_flags()
    w1, b1, w2, b2, w3, b3 = prepared_params
    return _projector_impl(points, w1, b1, w2, b2, w3, b3,
                           out_dim=out_dim, tile_m=tile_m,
                           use_mxu_l1=use_mxu_l1, bf16_epilogue=bf16_epilogue,
                           min_grid_steps=min_grid_steps)


def prepare_params(params):
    """One-time weight prep (call once, outside jit): pad output_dim to a
    lane multiple (zero columns, sliced off after the kernel) and pre-cast the
    MXU weights to bf16, so every call reuses identical device buffers."""
    w1, b1, w2, b2, w3, b3 = params
    D = w3.shape[1]
    D_pad = _round_up(D, 128)
    if D_pad != D:
        w3 = jnp.pad(w3, ((0, 0), (0, D_pad - D)))
        b3 = jnp.pad(b3, ((0, 0), (0, D_pad - D)))
    return (w1, b1,
            w2.astype(jnp.bfloat16), b2,
            w3.astype(jnp.bfloat16), b3)


def init_params(key, output_dim):
    """Deterministic init matching nn.Linear shapes (stored transposed: (in, out))."""
    ks = jax.random.split(key, 6)

    def linear(kw, kb, fan_in, fan_out):
        bound = 1.0 / jnp.sqrt(fan_in)
        w = jax.random.uniform(kw, (fan_in, fan_out), jnp.float32, -bound, bound)
        b = jax.random.uniform(kb, (1, fan_out), jnp.float32, -bound, bound)
        return w, b

    w1, b1 = linear(ks[0], ks[1], 3, 128)
    w2, b2 = linear(ks[2], ks[3], 128, 512)
    w3, b3 = linear(ks[4], ks[5], 512, output_dim)
    return (w1, b1, w2, b2, w3, b3)


def reference(points, params):
    """Pure-JAX f32 reference of the PyTorch forward."""
    w1, b1, w2, b2, w3, b3 = params
    h = jnp.maximum(points @ w1 + b1[0], 0.0)
    h = jnp.maximum(h @ w2 + b2[0], 0.0)
    return h @ w3 + b3[0]


if __name__ == "__main__":
    key = jax.random.PRNGKey(0)
    k_pts, k_par = jax.random.split(key)

    B, N, output_dim = 2, 64, 256
    points = jax.random.normal(k_pts, (B, N, 3), jnp.float32)
    params = init_params(k_par, output_dim)
    prepared = prepare_params(params)        # one-time pad + bf16 cast

    out = point_cloud_projector(points, prepared, output_dim)
    out = jax.block_until_ready(out)

    ref = reference(points, params)
    assert out.shape == (B, N, output_dim), out.shape
    # bf16 MXU operands / bf16 epilogues (f32 accumulation) vs f32 reference.
    max_err = float(jnp.max(jnp.abs(out - ref)))
    assert jnp.allclose(out, ref, atol=3e-2, rtol=3e-2), max_err
    print("KERNEL_OK")
</pallas_src>

<mosaic_0001>
module attributes {stable_mosaic.version = 11 : i64} {
  func.func @kernel(%arg0: i32, %arg1: memref<128x3xf32, #tpu.memory_space<vmem>>, %arg2: memref<3x128xf32, #tpu.memory_space<vmem>>, %arg3: memref<1x128xf32, #tpu.memory_space<vmem>>, %arg4: memref<128x512xbf16, #tpu.memory_space<vmem>>, %arg5: memref<1x512xf32, #tpu.memory_space<vmem>>, %arg6: memref<512x256xbf16, #tpu.memory_space<vmem>>, %arg7: memref<1x256xf32, #tpu.memory_space<vmem>>, %arg8: memref<128x256xf32, #tpu.memory_space<vmem>>) attributes {dimension_semantics = [#tpu.dimension_semantics<parallel>], iteration_bounds = array<i64: 1>, scalar_prefetch = 0 : i64, scratch_operands = 0 : i64, tpu.core_type = #tpu.core_type<tc>, window_params = [{transform_indices = @transform_0, window_bounds = array<i64: 128, 3>}, {pipeline_mode = #tpu.pipeline_mode<synchronous>, transform_indices = @transform_1, window_bounds = array<i64: 3, 128>}, {pipeline_mode = #tpu.pipeline_mode<synchronous>, transform_indices = @transform_2, window_bounds = array<i64: 1, 128>}, {pipeline_mode = #tpu.pipeline_mode<synchronous>, transform_indices = @transform_3, window_bounds = array<i64: 128, 512>}, {pipeline_mode = #tpu.pipeline_mode<synchronous>, transform_indices = @transform_4, window_bounds = array<i64: 1, 512>}, {pipeline_mode = #tpu.pipeline_mode<synchronous>, transform_indices = @transform_5, window_bounds = array<i64: 512, 256>}, {pipeline_mode = #tpu.pipeline_mode<synchronous>, transform_indices = @transform_6, window_bounds = array<i64: 1, 256>}, {transform_indices = @transform_7, window_bounds = array<i64: 128, 256>}]} {
    %c0 = arith.constant 0 : index
    %c0_0 = arith.constant 0 : index
    %0 = vector.load %arg1[%c0, %c0_0] : memref<128x3xf32, #tpu.memory_space<vmem>>, vector<128x3xf32>
    %c0_1 = arith.constant 0 : index
    %c0_2 = arith.constant 0 : index
    %1 = vector.load %arg2[%c0_1, %c0_2] : memref<3x128xf32, #tpu.memory_space<vmem>>, vector<3x128xf32>
    %cst = arith.constant dense<0.000000e+00> : vector<128x128xf32>
    %2 = tpu.matmul %0, %1, %cst {dimension_numbers = #tpu.dot_dimension_numbers<[1], [0], [0], [1], [0, 0, 1, 1], [], []>} : vector<128x3xf32>, vector<3x128xf32>, vector<128x128xf32> -> vector<128x128xf32>
    %3 = arith.truncf %2 : vector<128x128xf32> to vector<128x128xbf16>
    %c0_3 = arith.constant 0 : index
    %c0_4 = arith.constant 0 : index
    %4 = vector.load %arg3[%c0_3, %c0_4] : memref<1x128xf32, #tpu.memory_space<vmem>>, vector<1x128xf32>
    %5 = arith.truncf %4 : vector<1x128xf32> to vector<1x128xbf16>
    %6 = vector.broadcast %5 : vector<1x128xbf16> to vector<128x128xbf16>
    %7 = arith.addf %3, %6 : vector<128x128xbf16>
    %cst_5 = arith.constant 0.000000e+00 : bf16
    %8 = vector.broadcast %cst_5 : bf16 to vector<128x128xbf16>
    %9 = arith.maximumf %7, %8 : vector<128x128xbf16>
    %c0_6 = arith.constant 0 : index
    %c0_7 = arith.constant 0 : index
    %10 = vector.load %arg4[%c0_6, %c0_7] : memref<128x512xbf16, #tpu.memory_space<vmem>>, vector<128x512xbf16>
    %cst_8 = arith.constant dense<0.000000e+00> : vector<128x512xf32>
    %11 = tpu.matmul %9, %10, %cst_8 {dimension_numbers = #tpu.dot_dimension_numbers<[1], [0], [0], [1], [0, 0, 1, 1], [], []>} : vector<128x128xbf16>, vector<128x512xbf16>, vector<128x512xf32> -> vector<128x512xf32>
    %12 = arith.truncf %11 : vector<128x512xf32> to vector<128x512xbf16>
    %c0_9 = arith.constant 0 : index
    %c0_10 = arith.constant 0 : index
    %13 = vector.load %arg5[%c0_9, %c0_10] : memref<1x512xf32, #tpu.memory_space<vmem>>, vector<1x512xf32>
    %14 = arith.truncf %13 : vector<1x512xf32> to vector<1x512xbf16>
    %15 = vector.broadcast %14 : vector<1x512xbf16> to vector<128x512xbf16>
    %16 = arith.addf %12, %15 : vector<128x512xbf16>
    %cst_11 = arith.constant 0.000000e+00 : bf16
    %17 = vector.broadcast %cst_11 : bf16 to vector<128x512xbf16>
    %18 = arith.maximumf %16, %17 : vector<128x512xbf16>
    %c0_12 = arith.constant 0 : index
    %c0_13 = arith.constant 0 : index
    %19 = vector.load %arg6[%c0_12, %c0_13] : memref<512x256xbf16, #tpu.memory_space<vmem>>, vector<512x256xbf16>
    %cst_14 = arith.constant dense<0.000000e+00> : vector<128x256xf32>
    %20 = tpu.matmul %18, %19, %cst_14 {dimension_numbers = #tpu.dot_dimension_numbers<[1], [0], [0], [1], [0, 0, 1, 1], [], []>} : vector<128x512xbf16>, vector<512x256xbf16>, vector<128x256xf32> -> vector<128x256xf32>
    %c0_15 = arith.constant 0 : index
    %c0_16 = arith.constant 0 : index
    %21 = vector.load %arg7[%c0_15, %c0_16] : memref<1x256xf32, #tpu.memory_space<vmem>>, vector<1x256xf32>
    %22 = vector.broadcast %21 : vector<1x256xf32> to vector<128x256xf32>
    %23 = arith.addf %20, %22 : vector<128x256xf32>
    %c0_17 = arith.constant 0 : index
    %c0_18 = arith.constant 0 : index
    %24 = vector.load %arg8[%c0_17, %c0_18] : memref<128x256xf32, #tpu.memory_space<vmem>>, vector<128x256xf32>
    tpu.vector_store %arg8[%c0_17, %c0_18], %23 {strides = array<i32>} : memref<128x256xf32, #tpu.memory_space<vmem>>, vector<128x256xf32>,
    return
  }
  func.func @transform_0(%arg0: i32) -> (i32, i32) {
    %c0_i32 = arith.constant 0 : i32
    %c0_i32_0 = arith.constant 0 : i32
    return %arg0, %c0_i32 : i32, i32
  }
  func.func @transform_1(%arg0: i32) -> (i32, i32) {
    %c0_i32 = arith.constant 0 : i32
    %c0_i32_0 = arith.constant 0 : i32
    %c0_i32_1 = arith.constant 0 : i32
    return %c0_i32, %c0_i32_0 : i32, i32
  }
  func.func @transform_2(%arg0: i32) -> (i32, i32) {
    %c0_i32 = arith.constant 0 : i32
    %c0_i32_0 = arith.constant 0 : i32
    %c0_i32_1 = arith.constant 0 : i32
    return %c0_i32, %c0_i32_0 : i32, i32
  }
  func.func @transform_3(%arg0: i32) -> (i32, i32) {
    %c0_i32 = arith.constant 0 : i32
    %c0_i32_0 = arith.constant 0 : i32
    %c0_i32_1 = arith.constant 0 : i32
    return %c0_i32, %c0_i32_0 : i32, i32
  }
  func.func @transform_4(%arg0: i32) -> (i32, i32) {
    %c0_i32 = arith.constant 0 : i32
    %c0_i32_0 = arith.constant 0 : i32
    %c0_i32_1 = arith.constant 0 : i32
    return %c0_i32, %c0_i32_0 : i32, i32
  }
  func.func @transform_5(%arg0: i32) -> (i32, i32) {
    %c0_i32 = arith.constant 0 : i32
    %c0_i32_0 = arith.constant 0 : i32
    %c0_i32_1 = arith.constant 0 : i32
    return %c0_i32, %c0_i32_0 : i32, i32
  }
  func.func @transform_6(%arg0: i32) -> (i32, i32) {
    %c0_i32 = arith.constant 0 : i32
    %c0_i32_0 = arith.constant 0 : i32
    %c0_i32_1 = arith.constant 0 : i32
    return %c0_i32, %c0_i32_0 : i32, i32
  }
  func.func @transform_7(%arg0: i32) -> (i32, i32) {
    %c0_i32 = arith.constant 0 : i32
    %c0_i32_0 = arith.constant 0 : i32
    return %arg0, %c0_i32 : i32, i32
  }
}

</mosaic_0001>

<bundles_post_ra>
// kernel: _projector_impl.1
= control target key start
LH: loop header
LB: loop body
LE: loop exit
PB: predicated region body
PF: predicated region fallthrough
CT: control target
= control target key end

     0   :  { %12 = vsyncpa [#allocation3], 0  ;;  %s2333_s0 = inlined_call_operand.vmem [shape: f32[128,3], index: 0, kind: input, shape index: {}]   ;;  %s2334_s1 = inlined_call_operand.vmem [shape: f32[3,128], index: 1, kind: input, shape index: {}]   ;;  %s2335_s2 = inlined_call_operand.vmem [shape: f32[1,128], index: 2, kind: input, shape index: {}]   ;;  %s2336_s3 = inlined_call_operand.hbm [shape: bf16[128,512], index: 3, kind: input, shape index: {}]   ;;  %s2337_s4 = inlined_call_operand.vmem [shape: f32[1,512], index: 4, kind: input, shape index: {}]   ;;  %s2338_s5 = inlined_call_operand.hbm [shape: bf16[512,256], index: 5, kind: input, shape index: {}]   ;;  %s2339_s6 = inlined_call_operand.vmem [shape: f32[1,256], index: 6, kind: input, shape index: {}]   ;;  %s2340_s7 = inlined_call_operand.hbm [shape: f32[128,256], index: 7, kind: output, shape index: {}]  }
   0x1   :  { %13 = vsyncpa [#allocation6], 0 }
   0x2   :  { %14 = vsyncpa [#allocation4], 0  ;;  %s1988_s24 = smov [#allocation2]   ;;  %s1916_s28 = scalar_lea.hbm %s2336_s3, 4096 }
   0x3   :  { %s26_s25 = sshll.u32 %s1988_s24, 4  ;;  %p1917_p0 = scmp.ne.s32.totalorder %s2336_s3, %s1916_s28  ;;  %s27_s25 = int_to_ptr.vmem [resolvable:$true] %s26_s25 }
   0x4   :  { %p1920_p1 = scmp.lt.u32.totalorder %s1916_s28, %s2336_s3 }
   0x6   :  { %p1922_p2 = pnand %p1920_p1, %p1917_p0 }
   0x8   :  { %1925 = shalt.err (!%p1922_p2)
}
   0x9   :  { %s1926_s10 = scalar_lea.vmem %s27_s25, 4096  ;;  %p1931_p4 = scmp.lt.s32.totalorder %s27_s25, %s27_s25 }
   0xa   :  { %p1927_p3 = scmp.ne.s32.totalorder %s27_s25, %s1926_s10  ;;  %p1932_p5 = scmp.lt.s32.totalorder %s1926_s10, %s1926_s10 }
   0xc   :  { %p1933_p6 = por %p1932_p5, %p1931_p4 }
   0xe   :  { %p1934_p7 = pnand %p1933_p6, %p1927_p3 }
  0x10   :  { %1937 = shalt.err (!%p1934_p7)
}
  0x11   :  { %s1989_s11 = smov 256   ;;  %s1990_s12 = smov 16  }
  0x12   :  { %32 = dma.hbm_to_vmem [thread:$0]  %s2336_s3, 4096, %s27_s25, [#allocation3], %s1989_s11, %s1989_s11, %s1990_s12  }
  0x13   :  { %s1991_s15 = smov [#allocation5]   ;;  %s1938_s19 = scalar_lea.hbm %s2338_s5, 8192 }
  0x14   :  { %s40_s16 = sshll.u32 %s1991_s15, 4  ;;  %p1939_p8 = scmp.ne.s32.totalorder %s2338_s5, %s1938_s19  ;;  %s41_s16 = int_to_ptr.vmem [resolvable:$true] %s40_s16 }
  0x15   :  { %p1942_p9 = scmp.lt.u32.totalorder %s1938_s19, %s2338_s5 }
  0x17   :  { %p1944_p10 = pnand %p1942_p9, %p1939_p8 }
  0x19   :  { %1947 = shalt.err (!%p1944_p10)
}
  0x1a   :  { %s1948_s24 = scalar_lea.vmem %s41_s16, 8192  ;;  %p1953_p12 = scmp.lt.s32.totalorder %s41_s16, %s41_s16 }
  0x1b   :  { %p1949_p11 = scmp.ne.s32.totalorder %s41_s16, %s1948_s24  ;;  %p1954_p13 = scmp.lt.s32.totalorder %s1948_s24, %s1948_s24 }
  0x1d   :  { %p1955_p0 = por %p1954_p13, %p1953_p12 }
  0x1f   :  { %p1956_p1 = pnand %p1955_p0, %p1949_p11 }
  0x21   :  { %1959 = shalt.err (!%p1956_p1)
}
  0x22   :  { %s1992_s3 = smov 128   ;;  %s1993_s25 = smov 8  }
  0x23   :  { %46 = dma.hbm_to_vmem [thread:$0]  %s2338_s5, 8192, %s41_s16, [#allocation6], %s1992_s3, %s1992_s3, %s1993_s25  }
  0x24   :  { %1982 = dma.done.wait [#allocation3], 4096  }
  0x25   :  { %1983 = vsyncadd [#allocation3], 4294963200 }
  0x26   :  { %1984 = dma.done.wait [#allocation6], 8192  }
  0x27   :  { %1985 = vsyncadd [#allocation6], 4294959104  ;;  %vm122_vm0 = vcmask 1042432   ;;  %vm73_vm1 = vcmask 23552   ;;  %v72_v0 = vld [vmem:[%s2334_s1] sm:$0x7]  ;;  %v284_v52 = vlaneseq }
  0x28   :  { %v56_v1 = vld [vmem:[%s2333_s0] sm:$0xff]  ;;  %v57_v2 = vld [vmem:[%s2333_s0 + $0x8] sm:$0xff]  ;;  %1674 = vmatprep.subr.msk.mxu0 %vm122_vm0, %v72_v0  ;;  %v58_v3 = vld [vmem:[%s2333_s0 + $0x10] sm:$0xff]  ;;  %v1994_v49 = vmov 0  }
  0x29   :  { %1676 = vmatprep.mubr.msk.f32.mxu0 %vm73_vm1, %v56_v1  ;;  %1675 = vmatpush3.msk.msra.mxu0 %vm122_vm0, %v72_v0  ;;  %v59_v4 = vld [vmem:[%s2333_s0 + $0x18] sm:$0xff]  ;;  %v60_v5 = vld [vmem:[%s2333_s0 + $0x20] sm:$0xff]  ;;  %v61_v6 = vld [vmem:[%s2333_s0 + $0x28] sm:$0xff]  ;;  %v2135_v55 = vshrl.u32 %v284_v52, 7 }
  0x2a   :  { %1677 = vmatmul.mubr.msk.f32.vlgmr.msra.gmra.mrb[0].mxu0 %vm73_vm1, %v57_v2  ;;  %v1772_v7 = vld [vmem:[#allocation2 + $0x4] ss:$16 sps:$4 sm:$0xff]   ;;  %v1774_v9 = vld [vmem:[#allocation2 + $0x8] ss:$16 sps:$4 sm:$0xff]   ;;  %v1776_v10 = vld [vmem:[#allocation2 + $0xc] ss:$16 sps:$4 sm:$0xff]   ;;  %528 = vmatprep.mubr.bf16.mxu1 %v1994_v49 }
  0x2b   :  { %1679 = vmatprep.mubr.msk.f32.mxu0 %vm73_vm1, %v58_v3  ;;  %v62_v8 = vld [vmem:[%s2333_s0 + $0x30] sm:$0xff]  ;;  %496 = vmatprep.subr.bf16.mxu1 %v1772_v7  ;;  %v63_v13 = vld [vmem:[%s2333_s0 + $0x38] sm:$0xff]  ;;  %v64_v18 = vld [vmem:[%s2333_s0 + $0x40] sm:$0xff]  ;;  %v2138_v57 = vsub.s32 0, %v2135_v55 }
  0x2c   :  { %v1777_v11 = vld [vmem:[#allocation2] ss:$16 sps:$4 sm:$0xff]   ;;  %609 = vmatprep.subr.bf16.mxu0 %v1776_v10  ;;  %v1778_v12 = vld [vmem:[#allocation2 + $0x24] ss:$16 sps:$4 sm:$0xff]   ;;  %v1780_v14 = vld [vmem:[#allocation2 + $0x28] ss:$16 sps:$4 sm:$0xff]  }
  0x2d   :  { %497 = vmatpush1.bf16.msra.mxu1 %v1777_v11  ;;  %610 = vmatpush1.bf16.msra.mxu0 %v1774_v9  ;;  %v1782_v15 = vld [vmem:[#allocation2 + $0x2c] ss:$16 sps:$4 sm:$0xff]   ;;  %v1783_v16 = vld [vmem:[#allocation2 + $0x20] ss:$16 sps:$4 sm:$0xff]   ;;  %v1784_v17 = vld [vmem:[#allocation2 + $0x44] ss:$16 sps:$4 sm:$0xff]  }
  0x2e   :  { %1680 = vmatmul.mubr.msk.f32.gmra.mrb[2].mxu0 %vm73_vm1, %v59_v4  ;;  %498 = vmatprep.subr.bf16.mxu1 %v1778_v12  ;;  %v1786_v19 = vld [vmem:[#allocation2 + $0x48] ss:$16 sps:$4 sm:$0xff]   ;;  %v1788_v20 = vld [vmem:[#allocation2 + $0x4c] ss:$16 sps:$4 sm:$0xff]   ;;  %v1789_v21 = vld [vmem:[#allocation2 + $0x40] ss:$16 sps:$4 sm:$0xff]  }
  0x2f   :  { %1682 = vmatprep.mubr.msk.f32.mxu0 %vm73_vm1, %v60_v5  ;;  %611 = vmatprep.subr.bf16.mxu0 %v1782_v15  ;;  %v65_v22 = vld [vmem:[%s2333_s0 + $0x48] sm:$0xff]  ;;  %v1790_v23 = vld [vmem:[#allocation2 + $0x64] ss:$16 sps:$4 sm:$0xff]   ;;  %v67_v26 = vld [vmem:[%s2333_s0 + $0x58] sm:$0xff] }
  0x30   :  { %v1794_v24 = vld [vmem:[#allocation2 + $0x6c] ss:$16 sps:$4 sm:$0xff]   ;;  %v66_v25 = vld [vmem:[%s2333_s0 + $0x50] sm:$0xff]  ;;  %v1792_v27 = vld [vmem:[#allocation2 + $0x68] ss:$16 sps:$4 sm:$0xff]  }
  0x31   :  { %499 = vmatpush1.bf16.msra.mxu1 %v1783_v16  ;;  %612 = vmatpush1.bf16.msra.mxu0 %v1780_v14  ;;  %v1795_v28 = vld [vmem:[#allocation2 + $0x60] ss:$16 sps:$4 sm:$0xff]   ;;  %v1796_v30 = vld [vmem:[#allocation2 + $0x84] ss:$16 sps:$4 sm:$0xff]   ;;  %v1798_v31 = vld [vmem:[#allocation2 + $0x88] ss:$16 sps:$4 sm:$0xff]  }
  0x32   :  { %1683 = vmatmul.mubr.msk.f32.gmra.mrb[4].mxu0 %vm73_vm1, %v61_v6  ;;  %500 = vmatprep.subr.bf16.mxu1 %v1784_v17  ;;  %v68_v29 = vld [vmem:[%s2333_s0 + $0x60] sm:$0xff]  ;;  %v1800_v32 = vld [vmem:[#allocation2 + $0x8c] ss:$16 sps:$4 sm:$0xff]   ;;  %v70_v37 = vld [vmem:[%s2333_s0 + $0x70] sm:$0xff] }
  0x33   :  { %1685 = vmatprep.mubr.msk.f32.mxu0 %vm73_vm1, %v62_v8  ;;  %613 = vmatprep.subr.bf16.mxu0 %v1788_v20  ;;  %v1801_v33 = vld [vmem:[#allocation2 + $0x80] ss:$16 sps:$4 sm:$0xff]   ;;  %v1802_v34 = vld [vmem:[#allocation2 + $0xa4] ss:$16 sps:$4 sm:$0xff]   ;;  %v69_v35 = vld [vmem:[%s2333_s0 + $0x68] sm:$0xff] }
  0x34   :  { %v1806_v36 = vld [vmem:[#allocation2 + $0xac] ss:$16 sps:$4 sm:$0xff]   ;;  %v1804_v38 = vld [vmem:[#allocation2 + $0xa8] ss:$16 sps:$4 sm:$0xff]   ;;  %v1807_v39 = vld [vmem:[#allocation2 + $0xa0] ss:$16 sps:$4 sm:$0xff]  }
  0x35   :  { %501 = vmatpush1.bf16.msra.mxu1 %v1789_v21  ;;  %614 = vmatpush1.bf16.msra.mxu0 %v1786_v19  ;;  %v71_v40 = vld [vmem:[%s2333_s0 + $0x78] sm:$0xff]  ;;  %v1808_v41 = vld [vmem:[#allocation2 + $0xc4] ss:$16 sps:$4 sm:$0xff]   ;;  %v1813_v44 = vld [vmem:[#allocation2 + $0xc0] ss:$16 sps:$4 sm:$0xff]  }
  0x36   :  { %1686 = vmatmul.mubr.msk.f32.gmra.mrb[6].mxu0 %vm73_vm1, %v63_v13  ;;  %502 = vmatprep.subr.bf16.mxu1 %v1790_v23  ;;  %v1812_v42 = vld [vmem:[#allocation2 + $0xcc] ss:$16 sps:$4 sm:$0xff]   ;;  %v1810_v43 = vld [vmem:[#allocation2 + $0xc8] ss:$16 sps:$4 sm:$0xff]   ;;  %v1814_v45 = vld [vmem:[#allocation2 + $0xe4] ss:$16 sps:$4 sm:$0xff]  }
  0x37   :  { %1688 = vmatprep.mubr.msk.f32.mxu0 %vm73_vm1, %v64_v18  ;;  %615 = vmatprep.subr.bf16.mxu0 %v1794_v24  ;;  %v1818_v46 = vld [vmem:[#allocation2 + $0xec] ss:$16 sps:$4 sm:$0xff]   ;;  %v1816_v47 = vld [vmem:[#allocation2 + $0xe8] ss:$16 sps:$4 sm:$0xff]   ;;  %v1819_v48 = vld [vmem:[#allocation2 + $0xe0] ss:$16 sps:$4 sm:$0xff]  }
  0x38   :  { %v1822_v50 = vld [vmem:[#allocation5 + $0x4] ss:$8 sps:$4 sm:$0xff]   ;;  %v279_v53 = vld [vmem:[%s2335_s2] sm:$0x1]  ;;  %v1828_v5 = vld [vmem:[#allocation5 + $0x14] ss:$8 sps:$4 sm:$0xff]  }
  0x39   :  { %503 = vmatpush1.bf16.msra.mxu1 %v1795_v28  ;;  %616 = vmatpush1.bf16.msra.mxu0 %v1792_v27  ;;  %v1825_v51 = vld [vmem:[#allocation5 + $0x104] ss:$8 sps:$4 sm:$0xff]   ;;  %v280_v54 = vpack.c.bf16 %v279_v53, %v279_v53  ;;  %v1820_v3 = vld [vmem:[#allocation5] ss:$8 sps:$4 sm:$0xff]   ;;  %v1831_v6 = vld [vmem:[#allocation5 + $0x114] ss:$8 sps:$4 sm:$0xff]  }
  0x3a   :  { %1689 = vmatmul.mubr.msk.f32.gmra.mrb[8].mxu0 %vm73_vm1, %v65_v22  ;;  %504 = vmatprep.subr.bf16.mxu1 %v1796_v30  ;;  %v1823_v4 = vld [vmem:[#allocation5 + $0x100] ss:$8 sps:$4 sm:$0xff]   ;;  %v1826_v11 = vld [vmem:[#allocation5 + $0x10] ss:$8 sps:$4 sm:$0xff]   ;;  %v1834_v13 = vld [vmem:[#allocation5 + $0x24] ss:$8 sps:$4 sm:$0xff]  }
  0x3b   :  { %1691 = vmatprep.mubr.msk.f32.mxu0 %vm73_vm1, %v66_v25  ;;  %617 = vmatprep.subr.bf16.mxu0 %v1800_v32  ;;  %v282_v56 = vpack.i.b16 %v280_v54, %v280_v54  ;;  %v1829_v12 = vld [vmem:[#allocation5 + $0x110] ss:$8 sps:$4 sm:$0xff]   ;;  %v1837_v14 = vld [vmem:[#allocation5 + $0x124] ss:$8 sps:$4 sm:$0xff]   ;;  %v1832_v19 = vld [vmem:[#allocation5 + $0x20] ss:$8 sps:$4 sm:$0xff]  }
  0x3c   :  { %v1835_v20 = vld [vmem:[#allocation5 + $0x120] ss:$8 sps:$4 sm:$0xff]   ;;  %v1840_v21 = vld [vmem:[#allocation5 + $0x34] ss:$8 sps:$4 sm:$0xff]   ;;  %v1838_v27 = vld [vmem:[#allocation5 + $0x30] ss:$8 sps:$4 sm:$0xff]  }
  0x3d   :  { %505 = vmatpush1.bf16.msra.mxu1 %v1801_v33  ;;  %618 = vmatpush1.bf16.msra.mxu0 %v1798_v31  ;;  %v2141_v59 = vrot.slane %v282_v56, %v2138_v57  ;;  %v1843_v22 = vld [vmem:[#allocation5 + $0x134] ss:$8 sps:$4 sm:$0xff]   ;;  %v1841_v28 = vld [vmem:[#allocation5 + $0x130] ss:$8 sps:$4 sm:$0xff]   ;;  %v1849_v30 = vld [vmem:[#allocation5 + $0x144] ss:$8 sps:$4 sm:$0xff]  }
  0x3e   :  { %1692 = vmatmul.mubr.msk.f32.gmra.mrb[10].mxu0 %vm73_vm1, %v67_v26  ;;  %506 = vmatprep.subr.bf16.mxu1 %v1802_v34  ;;  %v1856_v52 = vld [vmem:[#allocation5 + $0x60] ss:$8 sps:$4 sm:$0xff]   ;;  %v1864_v54 = vld [vmem:[#allocation5 + $0x74] ss:$8 sps:$4 sm:$0xff]  }
  0x3f   :  { %1694 = vmatprep.mubr.msk.f32.mxu0 %vm73_vm1, %v68_v29  ;;  %619 = vmatprep.subr.bf16.mxu0 %v1806_v36  ;;  %v1846_v29 = vld [vmem:[#allocation5 + $0x44] ss:$8 sps:$4 sm:$0xff]   ;;  %v1847_v36 = vld [vmem:[#allocation5 + $0x140] ss:$8 sps:$4 sm:$0xff]   ;;  %v1867_v56 = vld [vmem:[#allocation5 + $0x174] ss:$8 sps:$4 sm:$0xff]  }
  0x40   :  { %v1859_v53 = vld [vmem:[#allocation5 + $0x160] ss:$8 sps:$4 sm:$0xff]  }
  0x41   :  { %507 = vmatpush1.bf16.msra.mxu1 %v1807_v39  ;;  %620 = vmatpush1.bf16.msra.mxu0 %v1804_v38  ;;  %v1855_v38 = vld [vmem:[#allocation5 + $0x154] ss:$8 sps:$4 sm:$0xff]  }
  0x42   :  { %1695 = vmatmul.mubr.msk.f32.gmra.mrb[12].mxu0 %vm73_vm1, %v69_v35  ;;  %508 = vmatprep.subr.bf16.mxu1 %v1808_v41  ;;  %v1844_v35 = vld [vmem:[#allocation5 + $0x40] ss:$8 sps:$4 sm:$0xff]  }
  0x43   :  { %1697 = vmatprep.mubr.msk.f32.mxu0 %vm73_vm1, %v70_v37  ;;  %621 = vmatprep.subr.bf16.mxu0 %v1812_v42  ;;  %v1852_v37 = vld [vmem:[#allocation5 + $0x54] ss:$8 sps:$4 sm:$0xff]  }
  0x45   :  { %509 = vmatpush1.bf16.msra.mxu1 %v1813_v44  ;;  %622 = vmatpush1.bf16.msra.mxu0 %v1810_v43  ;;  %v1850_v43 = vld [vmem:[#allocation5 + $0x50] ss:$8 sps:$4 sm:$0xff]  }
  0x46   :  { %1698 = vmatmul.mubr.msk.f32.gmra.mrb[14].mxu0 %vm73_vm1, %v71_v40  ;;  %510 = vmatprep.subr.bf16.mxu1 %v1814_v45  ;;  %v1853_v44 = vld [vmem:[#allocation5 + $0x150] ss:$8 sps:$4 sm:$0xff]   ;;  %v1858_v45 = vld [vmem:[#allocation5 + $0x64] ss:$8 sps:$4 sm:$0xff]  }
  0x47   :  { %623 = vmatprep.subr.bf16.mxu0 %v1818_v46  ;;  %641 = vmatprep.mubr.bf16.mxu0 %v1994_v49  ;;  %v1861_v46 = vld [vmem:[#allocation5 + $0x164] ss:$8 sps:$4 sm:$0xff]  }
  0x49   :  { %511 = vmatpush1.bf16.msra.mxu1 %v1819_v48  ;;  %624 = vmatpush1.bf16.msra.mxu0 %v1816_v47 }
  0x4a   :  { %1268 = vmatprep.subr.bf16.mxu0 %v1822_v50  ;;  %1381 = vmatprep.subr.bf16.mxu1 %v1825_v51 }
  0xfd   :  { %v1678_v58 = vpop.f32.mrb[0].mxu0 }
  0xfe   :  { %v192_v60 = vpop.f32.mrb[1].mxu0 }
  0xff   :  { %v271_v61 = vpack.c.bf16 %v1678_v58, %v192_v60  ;;  %v1862_v60 = vld [vmem:[#allocation5 + $0x70] ss:$8 sps:$4 sm:$0xff]  }
 0x101   :  { %v288_v62 = vadd.bf16 %v2141_v59, %v271_v61  ;;  %v1681_v63 = vpop.f32.mrb[2].mxu0  ;;  %v1865_v61 = vld [vmem:[#allocation5 + $0x170] ss:$8 sps:$4 sm:$0xff]  }
 0x102   :  { %v202_v0 = vpop.f32.mrb[3].mxu0 }
 0x103   :  { %v272_v1 = vpack.c.bf16 %v1681_v63, %v202_v0  ;;  %v296_v2 = vmax.bf16 %v1994_v49, %v288_v62  ;;  %v1870_v62 = vld [vmem:[#allocation5 + $0x84] ss:$8 sps:$4 sm:$0xff]  }
 0x104   :  { %v1873_v63 = vld [vmem:[#allocation5 + $0x184] ss:$8 sps:$4 sm:$0xff]  }
 0x105   :  { %v289_v7 = vadd.bf16 %v2141_v59, %v272_v1  ;;  %529 = vmatmul.mubr.bf16.vlgmr.msra.gmra.mrb[0].mxu1 %v296_v2  ;;  %642 = vmatmul.mubr.bf16.vlgmr.msra.gmra.mrb[16].mxu0 %v296_v2  ;;  %v1684_v8 = vpop.f32.mrb[4].mxu0  ;;  %v1868_v1 = vld [vmem:[#allocation5 + $0x80] ss:$8 sps:$4 sm:$0xff]  }
 0x106   :  { %538 = vmatprep.mubr.bf16.mxu1 %v1994_v49  ;;  %651 = vmatprep.mubr.bf16.mxu0 %v1994_v49  ;;  %v212_v9 = vpop.f32.mrb[5].mxu0  ;;  %v1871_v2 = vld [vmem:[#allocation5 + $0x180] ss:$8 sps:$4 sm:$0xff]  }
 0x107   :  { %v273_v10 = vpack.c.bf16 %v1684_v8, %v212_v9  ;;  %1269 = vmatpush1.bf16.msra.mxu0 %v1820_v3  ;;  %1382 = vmatpush1.bf16.msra.mxu1 %v1823_v4  ;;  %v297_v15 = vmax.bf16 %v1994_v49, %v289_v7  ;;  %v1876_v3 = vld [vmem:[#allocation5 + $0x94] ss:$8 sps:$4 sm:$0xff]   ;;  %v1877_v7 = vld [vmem:[#allocation5 + $0x190] ss:$8 sps:$4 sm:$0xff]   ;;  %v1882_v8 = vld [vmem:[#allocation5 + $0xa4] ss:$8 sps:$4 sm:$0xff]  }
 0x108   :  { %1270 = vmatprep.subr.bf16.mxu0 %v1828_v5  ;;  %1383 = vmatprep.subr.bf16.mxu1 %v1831_v6  ;;  %v1879_v4 = vld [vmem:[#allocation5 + $0x194] ss:$8 sps:$4 sm:$0xff]   ;;  %v1874_v6 = vld [vmem:[#allocation5 + $0x90] ss:$8 sps:$4 sm:$0xff]   ;;  %v1885_v9 = vld [vmem:[#allocation5 + $0x1a4] ss:$8 sps:$4 sm:$0xff]  }
 0x109   :  { %v1687_v16 = vpop.f32.mrb[6].mxu0  ;;  %v290_v23 = vadd.bf16 %v2141_v59, %v273_v10 }
 0x10a   :  { %v222_v17 = vpop.f32.mrb[7].mxu0 }
 0x10b   :  { %v274_v18 = vpack.c.bf16 %v1687_v16, %v222_v17  ;;  %1271 = vmatpush1.bf16.msra.mxu0 %v1826_v11  ;;  %1384 = vmatpush1.bf16.msra.mxu1 %v1829_v12  ;;  %v298_v31 = vmax.bf16 %v1994_v49, %v290_v23  ;;  %v1880_v11 = vld [vmem:[#allocation5 + $0xa0] ss:$8 sps:$4 sm:$0xff]   ;;  %v1886_v16 = vld [vmem:[#allocation5 + $0xb0] ss:$8 sps:$4 sm:$0xff]   ;;  %v1900_v23 = vld [vmem:[#allocation5 + $0xd4] ss:$8 sps:$4 sm:$0xff]  }
 0x10c   :  { %1272 = vmatprep.subr.bf16.mxu0 %v1834_v13  ;;  %1385 = vmatprep.subr.bf16.mxu1 %v1837_v14  ;;  %v1883_v12 = vld [vmem:[#allocation5 + $0x1a0] ss:$8 sps:$4 sm:$0xff]   ;;  %v1888_v13 = vld [vmem:[#allocation5 + $0xb4] ss:$8 sps:$4 sm:$0xff]   ;;  %v1889_v17 = vld [vmem:[#allocation5 + $0x1b0] ss:$8 sps:$4 sm:$0xff]  }
 0x10d   :  { %539 = vmatmul.mubr.bf16.gmra.mrb[4].mxu1 %v297_v15  ;;  %652 = vmatmul.mubr.bf16.gmra.mrb[20].mxu0 %v297_v15  ;;  %v1690_v24 = vpop.f32.mrb[8].mxu0  ;;  %v291_v39 = vadd.bf16 %v2141_v59, %v274_v18  ;;  %v1891_v14 = vld [vmem:[#allocation5 + $0x1b4] ss:$8 sps:$4 sm:$0xff]   ;;  %v1894_v18 = vld [vmem:[#allocation5 + $0xc4] ss:$8 sps:$4 sm:$0xff]  }
 0x10e   :  { %548 = vmatprep.mubr.bf16.mxu1 %v1994_v49  ;;  %661 = vmatprep.mubr.bf16.mxu0 %v1994_v49  ;;  %v232_v25 = vpop.f32.mrb[9].mxu0 }
 0x10f   :  { %v275_v26 = vpack.c.bf16 %v1690_v24, %v232_v25  ;;  %1273 = vmatpush1.bf16.msra.mxu0 %v1832_v19  ;;  %1386 = vmatpush1.bf16.msra.mxu1 %v1835_v20  ;;  %v299_v47 = vmax.bf16 %v1994_v49, %v291_v39  ;;  %v1897_v19 = vld [vmem:[#allocation5 + $0x1c4] ss:$8 sps:$4 sm:$0xff]   ;;  %v1903_v24 = vld [vmem:[#allocation5 + $0x1d4] ss:$8 sps:$4 sm:$0xff]   ;;  %v770_v39 = vsub.s32 3, %v2135_v55 }
 0x110   :  { %1274 = vmatprep.subr.bf16.mxu0 %v1840_v21  ;;  %1387 = vmatprep.subr.bf16.mxu1 %v1843_v22  ;;  %v1892_v21 = vld [vmem:[#allocation5 + $0xc0] ss:$8 sps:$4 sm:$0xff]  }
 0x111   :  { %v1693_v32 = vpop.f32.mrb[10].mxu0  ;;  %v292_v58 = vadd.bf16 %v2141_v59, %v275_v26  ;;  %v1895_v22 = vld [vmem:[#allocation5 + $0x1c0] ss:$8 sps:$4 sm:$0xff]   ;;  %v1898_v26 = vld [vmem:[#allocation5 + $0xd0] ss:$8 sps:$4 sm:$0xff]  }
 0x112   :  { %v242_v33 = vpop.f32.mrb[11].mxu0 }
 0x113   :  { %v276_v34 = vpack.c.bf16 %v1693_v32, %v242_v33  ;;  %1275 = vmatpush1.bf16.msra.mxu0 %v1838_v27  ;;  %1388 = vmatpush1.bf16.msra.mxu1 %v1841_v28  ;;  %v300_v0 = vmax.bf16 %v1994_v49, %v292_v58  ;;  %v1901_v27 = vld [vmem:[#allocation5 + $0x1d0] ss:$8 sps:$4 sm:$0xff]   ;;  %v1912_v32 = vld [vmem:[#allocation5 + $0xf4] ss:$8 sps:$4 sm:$0xff]  }
 0x114   :  { %1276 = vmatprep.subr.bf16.mxu0 %v1846_v29  ;;  %1389 = vmatprep.subr.bf16.mxu1 %v1849_v30  ;;  %v1906_v29 = vld [vmem:[#allocation5 + $0xe4] ss:$8 sps:$4 sm:$0xff]   ;;  %v1904_v30 = vld [vmem:[#allocation5 + $0xe0] ss:$8 sps:$4 sm:$0xff]   ;;  %v1915_v33 = vld [vmem:[#allocation5 + $0x1f4] ss:$8 sps:$4 sm:$0xff]  }
 0x115   :  { %549 = vmatmul.mubr.bf16.gmra.mrb[8].mxu1 %v298_v31  ;;  %662 = vmatmul.mubr.bf16.gmra.mrb[24].mxu0 %v298_v31  ;;  %v2154_v40 = vpop.f32.mrb[12].mxu0  ;;  %v293_v5 = vadd.bf16 %v2141_v59, %v276_v34  ;;  %v1907_v31 = vld [vmem:[#allocation5 + $0x1e0] ss:$8 sps:$4 sm:$0xff]   ;;  %v1910_v34 = vld [vmem:[#allocation5 + $0xf0] ss:$8 sps:$4 sm:$0xff]  }
 0x116   :  { %558 = vmatprep.mubr.bf16.mxu1 %v1994_v49  ;;  %671 = vmatprep.mubr.bf16.mxu0 %v1994_v49  ;;  %v2158_v41 = vpop.f32.mrb[13].mxu0 }
 0x117   :  { %v277_v42 = vpack.c.bf16 %v2154_v40, %v2158_v41  ;;  %1277 = vmatpush1.bf16.msra.mxu0 %v1844_v35  ;;  %1390 = vmatpush1.bf16.msra.mxu1 %v1847_v36  ;;  %v301_v10 = vmax.bf16 %v1994_v49, %v293_v5  ;;  %v1913_v35 = vld [vmem:[#allocation5 + $0x1f0] ss:$8 sps:$4 sm:$0xff]   ;;  %v766_v36 = vsub.s32 2, %v2135_v55 }
 0x118   :  { %1278 = vmatprep.subr.bf16.mxu0 %v1852_v37  ;;  %1391 = vmatprep.subr.bf16.mxu1 %v1855_v38  ;;  %v754_v37 = vld [vmem:[%s2337_s4] sm:$0xf]  ;;  %v762_v38 = vsub.s32 1, %v2135_v55 }
 0x119   :  { %v2163_v48 = vpop.f32.mrb[14].mxu0  ;;  %v294_v15 = vadd.bf16 %v2141_v59, %v277_v42  ;;  %v759_v40 = vrot.slane %v754_v37, %v2138_v57  ;;  %v767_v41 = vrot.slane %v754_v37, %v766_v36 }
 0x11a   :  { %v2165_v50 = vpop.f32.mrb[15].mxu0  ;;  %v763_v42 = vrot.slane %v754_v37, %v762_v38 }
 0x11b   :  { %v278_v51 = vpack.c.bf16 %v2163_v48, %v2165_v50  ;;  %1279 = vmatpush1.bf16.msra.mxu0 %v1850_v43  ;;  %1392 = vmatpush1.bf16.msra.mxu1 %v1853_v44  ;;  %v302_v20 = vmax.bf16 %v1994_v49, %v294_v15  ;;  %v771_v43 = vrot.slane %v754_v37, %v770_v39 }
 0x11c   :  { %1280 = vmatprep.subr.bf16.mxu0 %v1858_v45  ;;  %1393 = vmatprep.subr.bf16.mxu1 %v1861_v46  ;;  %v776_v44 = vpack.c.bf16 %v759_v40, %v759_v40  ;;  %v778_v45 = vpack.c.bf16 %v767_v41, %v767_v41  ;;  %v777_v46 = vpack.c.bf16 %v763_v42, %v763_v42 }
 0x11d   :  { %559 = vmatmul.mubr.bf16.gmra.mrb[12].mxu1 %v299_v47  ;;  %672 = vmatmul.mubr.bf16.gmra.mrb[28].mxu0 %v299_v47  ;;  %v295_v25 = vadd.bf16 %v2141_v59, %v278_v51  ;;  %v1909_v59 = vld [vmem:[#allocation5 + $0x1e4] ss:$8 sps:$4 sm:$0xff]   ;;  %v779_v47 = vpack.c.bf16 %v771_v43, %v771_v43 }
 0x11e   :  { %568 = vmatprep.mubr.bf16.mxu1 %v1994_v49  ;;  %681 = vmatprep.mubr.bf16.mxu0 %v1994_v49  ;;  %v781_v48 = vpack.i.b16 %v776_v44, %v776_v44  ;;  %v795_v50 = vpack.i.b16 %v778_v45, %v778_v45  ;;  %v788_v51 = vpack.i.b16 %v777_v46, %v777_v46 }
 0x11f   :  { %1281 = vmatpush1.bf16.msra.mxu0 %v1856_v52  ;;  %1394 = vmatpush1.bf16.msra.mxu1 %v1859_v53  ;;  %v303_v28 = vmax.bf16 %v1994_v49, %v295_v25  ;;  %v802_v52 = vpack.i.b16 %v779_v47, %v779_v47 }
 0x120   :  { %1282 = vmatprep.subr.bf16.mxu0 %v1864_v54  ;;  %1395 = vmatprep.subr.bf16.mxu1 %v1867_v56 }
 0x123   :  { %1283 = vmatpush1.bf16.msra.mxu0 %v1862_v60  ;;  %1396 = vmatpush1.bf16.msra.mxu1 %v1865_v61  ;;  %v2201_v60 = vrot.slane %v781_v48, %v2138_v57  ;;  %v2204_v61 = vrot.slane %v795_v50, %v2138_v57 }
 0x124   :  { %1284 = vmatprep.subr.bf16.mxu0 %v1870_v62  ;;  %1397 = vmatprep.subr.bf16.mxu1 %v1873_v63 }
 0x125   :  { %569 = vmatmul.mubr.bf16.gmra.mrb[16].mxu1 %v300_v0  ;;  %682 = vmatmul.mubr.bf16.gmra.mrb[32].mxu0 %v300_v0  ;;  %v2207_v0 = vrot.slane %v788_v51, %v2138_v57 }
 0x126   :  { %578 = vmatprep.mubr.bf16.mxu1 %v1994_v49  ;;  %691 = vmatprep.mubr.bf16.mxu0 %v1994_v49 }
 0x127   :  { %1285 = vmatpush1.bf16.msra.mxu0 %v1868_v1  ;;  %1398 = vmatpush1.bf16.msra.mxu1 %v1871_v2  ;;  %v2210_v1 = vrot.slane %v802_v52, %v2138_v57 }
 0x128   :  { %1286 = vmatprep.subr.bf16.mxu0 %v1876_v3  ;;  %1399 = vmatprep.subr.bf16.mxu1 %v1879_v4 }
 0x12b   :  { %1287 = vmatpush1.bf16.msra.mxu0 %v1874_v6  ;;  %1400 = vmatpush1.bf16.msra.mxu1 %v1877_v7 }
 0x12c   :  { %1288 = vmatprep.subr.bf16.mxu0 %v1882_v8  ;;  %1401 = vmatprep.subr.bf16.mxu1 %v1885_v9 }
 0x12d   :  { %579 = vmatmul.mubr.bf16.gmra.mrb[20].mxu1 %v301_v10  ;;  %692 = vmatmul.mubr.bf16.gmra.mrb[36].mxu0 %v301_v10 }
 0x12e   :  { %588 = vmatprep.mubr.bf16.mxu1 %v1994_v49  ;;  %701 = vmatprep.mubr.bf16.mxu0 %v1994_v49 }
 0x12f   :  { %1289 = vmatpush1.bf16.msra.mxu0 %v1880_v11  ;;  %1402 = vmatpush1.bf16.msra.mxu1 %v1883_v12 }
 0x130   :  { %1290 = vmatprep.subr.bf16.mxu0 %v1888_v13  ;;  %1403 = vmatprep.subr.bf16.mxu1 %v1891_v14 }
 0x133   :  { %1291 = vmatpush1.bf16.msra.mxu0 %v1886_v16  ;;  %1404 = vmatpush1.bf16.msra.mxu1 %v1889_v17 }
 0x134   :  { %1292 = vmatprep.subr.bf16.mxu0 %v1894_v18  ;;  %1405 = vmatprep.subr.bf16.mxu1 %v1897_v19 }
 0x135   :  { %589 = vmatmul.mubr.bf16.gmra.mrb[24].mxu1 %v302_v20  ;;  %702 = vmatmul.mubr.bf16.gmra.mrb[40].mxu0 %v302_v20 }
 0x136   :  { %598 = vmatprep.mubr.bf16.mxu1 %v1994_v49  ;;  %711 = vmatprep.mubr.bf16.mxu0 %v1994_v49 }
 0x137   :  { %1293 = vmatpush1.bf16.msra.mxu0 %v1892_v21  ;;  %1406 = vmatpush1.bf16.msra.mxu1 %v1895_v22 }
 0x138   :  { %1294 = vmatprep.subr.bf16.mxu0 %v1900_v23  ;;  %1407 = vmatprep.subr.bf16.mxu1 %v1903_v24 }
 0x13b   :  { %1295 = vmatpush1.bf16.msra.mxu0 %v1898_v26  ;;  %1408 = vmatpush1.bf16.msra.mxu1 %v1901_v27 }
 0x13c   :  { %1296 = vmatprep.subr.bf16.mxu0 %v1906_v29  ;;  %1409 = vmatprep.subr.bf16.mxu1 %v1909_v59 }
 0x13d   :  { %599 = vmatmul.mubr.bf16.gmra.mrb[28].mxu1 %v303_v28  ;;  %712 = vmatmul.mubr.bf16.gmra.mrb[44].mxu0 %v303_v28 }
 0x13f   :  { %1297 = vmatpush1.bf16.msra.mxu0 %v1904_v30  ;;  %1410 = vmatpush1.bf16.msra.mxu1 %v1907_v31 }
 0x140   :  { %1298 = vmatprep.subr.bf16.mxu0 %v1912_v32  ;;  %1411 = vmatprep.subr.bf16.mxu1 %v1915_v33 }
 0x143   :  { %1299 = vmatpush1.bf16.msra.mxu0 %v1910_v34  ;;  %1412 = vmatpush1.bf16.msra.mxu1 %v1913_v35 }
 0x1d8   :  { %v530_v53 = vpop.f32.mrb[0].mxu1  ;;  %v643_v54 = vpop.f32.mrb[16].mxu0 }
 0x1d9   :  { %v532_v56 = vpop.f32.mrb[1].mxu1  ;;  %v645_v58 = vpop.f32.mrb[17].mxu0 }
 0x1da   :  { %v534_v62 = vpop.f32.mrb[2].mxu1  ;;  %v647_v63 = vpop.f32.mrb[18].mxu0 }
 0x1db   :  { %v722_v2 = vpack.c.bf16 %v534_v62, %v530_v53  ;;  %v724_v3 = vpack.c.bf16 %v647_v63, %v643_v54  ;;  %v536_v4 = vpop.f32.mrb[3].mxu1  ;;  %v649_v5 = vpop.f32.mrb[19].mxu0 }
 0x1dc   :  { %v723_v6 = vpack.c.bf16 %v536_v4, %v532_v56  ;;  %v725_v7 = vpack.c.bf16 %v649_v5, %v645_v58 }
 0x1dd   :  { %v808_v8 = vadd.bf16 %v2201_v60, %v722_v2  ;;  %v810_v9 = vadd.bf16 %v2204_v61, %v724_v3 }
 0x1de   :  { %v809_v10 = vadd.bf16 %v2207_v0, %v723_v6  ;;  %v811_v11 = vadd.bf16 %v2210_v1, %v725_v7 }
 0x1df   :  { %v840_v16 = vmax.bf16 %v1994_v49, %v808_v8  ;;  %v842_v17 = vmax.bf16 %v1994_v49, %v810_v9 }
 0x1e0   :  { %v540_v12 = vpop.f32.mrb[4].mxu1  ;;  %v653_v13 = vpop.f32.mrb[20].mxu0  ;;  %v841_v14 = vmax.bf16 %v1994_v49, %v809_v10  ;;  %v843_v15 = vmax.bf16 %v1994_v49, %v811_v11 }
 0x1e1   :  { %v542_v18 = vpop.f32.mrb[5].mxu1  ;;  %v655_v19 = vpop.f32.mrb[21].mxu0 }
 0x1e2   :  { %v544_v20 = vpop.f32.mrb[6].mxu1  ;;  %v657_v21 = vpop.f32.mrb[22].mxu0  ;;  %1300 = vmatprep.mubr.bf16.mxu0 %v841_v14  ;;  %1413 = vmatprep.mubr.bf16.mxu1 %v843_v15 }
 0x1e3   :  { %v726_v22 = vpack.c.bf16 %v544_v20, %v540_v12  ;;  %v728_v23 = vpack.c.bf16 %v657_v21, %v653_v13  ;;  %v546_v24 = vpop.f32.mrb[7].mxu1  ;;  %v659_v25 = vpop.f32.mrb[23].mxu0  ;;  %1301 = vmatmul.mubr.bf16.vlgmr.msra.gmra.mrb[48].mxu0 %v840_v16  ;;  %1414 = vmatmul.mubr.bf16.vlgmr.msra.gmra.mrb[32].mxu1 %v842_v17 }
 0x1e4   :  { %v727_v26 = vpack.c.bf16 %v546_v24, %v542_v18  ;;  %v729_v27 = vpack.c.bf16 %v659_v25, %v655_v19 }
 0x1e5   :  { %v812_v28 = vadd.bf16 %v2201_v60, %v726_v22  ;;  %v814_v29 = vadd.bf16 %v2204_v61, %v728_v23 }
 0x1e6   :  { %v813_v59 = vadd.bf16 %v2207_v0, %v727_v26  ;;  %v815_v30 = vadd.bf16 %v2210_v1, %v729_v27 }
 0x1e7   :  { %v844_v37 = vmax.bf16 %v1994_v49, %v812_v28  ;;  %v846_v39 = vmax.bf16 %v1994_v49, %v814_v29 }
 0x1e8   :  { %v550_v31 = vpop.f32.mrb[8].mxu1  ;;  %v663_v32 = vpop.f32.mrb[24].mxu0  ;;  %v845_v33 = vmax.bf16 %v1994_v49, %v813_v59  ;;  %v847_v34 = vmax.bf16 %v1994_v49, %v815_v30 }
 0x1e9   :  { %v552_v35 = vpop.f32.mrb[9].mxu1  ;;  %v665_v36 = vpop.f32.mrb[25].mxu0 }
 0x1ea   :  { %v554_v40 = vpop.f32.mrb[10].mxu1  ;;  %v667_v41 = vpop.f32.mrb[26].mxu0  ;;  %1310 = vmatprep.mubr.bf16.mxu0 %v845_v33  ;;  %1423 = vmatprep.mubr.bf16.mxu1 %v847_v34 }
 0x1eb   :  { %v730_v42 = vpack.c.bf16 %v554_v40, %v550_v31  ;;  %v732_v43 = vpack.c.bf16 %v667_v41, %v663_v32  ;;  %v556_v44 = vpop.f32.mrb[11].mxu1  ;;  %v669_v45 = vpop.f32.mrb[27].mxu0  ;;  %1311 = vmatmul.mubr.bf16.gmra.mrb[52].mxu0 %v844_v37  ;;  %1424 = vmatmul.mubr.bf16.gmra.mrb[36].mxu1 %v846_v39 }
 0x1ec   :  { %v731_v46 = vpack.c.bf16 %v556_v44, %v552_v35  ;;  %v733_v47 = vpack.c.bf16 %v669_v45, %v665_v36 }
 0x1ed   :  { %v816_v48 = vadd.bf16 %v2201_v60, %v730_v42  ;;  %v818_v50 = vadd.bf16 %v2204_v61, %v732_v43 }
 0x1ee   :  { %v817_v51 = vadd.bf16 %v2207_v0, %v731_v46  ;;  %v819_v52 = vadd.bf16 %v2210_v1, %v733_v47 }
 0x1ef   :  { %v848_v2 = vmax.bf16 %v1994_v49, %v816_v48  ;;  %v850_v3 = vmax.bf16 %v1994_v49, %v818_v50 }
 0x1f0   :  { %v560_v53 = vpop.f32.mrb[12].mxu1  ;;  %v673_v54 = vpop.f32.mrb[28].mxu0  ;;  %v849_v56 = vmax.bf16 %v1994_v49, %v817_v51  ;;  %v851_v58 = vmax.bf16 %v1994_v49, %v819_v52 }
 0x1f1   :  { %v562_v62 = vpop.f32.mrb[13].mxu1  ;;  %v675_v63 = vpop.f32.mrb[29].mxu0 }
 0x1f2   :  { %v564_v4 = vpop.f32.mrb[14].mxu1  ;;  %v677_v5 = vpop.f32.mrb[30].mxu0  ;;  %1320 = vmatprep.mubr.bf16.mxu0 %v849_v56  ;;  %1433 = vmatprep.mubr.bf16.mxu1 %v851_v58 }
 0x1f3   :  { %v734_v6 = vpack.c.bf16 %v564_v4, %v560_v53  ;;  %v736_v7 = vpack.c.bf16 %v677_v5, %v673_v54  ;;  %v566_v8 = vpop.f32.mrb[15].mxu1  ;;  %v679_v9 = vpop.f32.mrb[31].mxu0  ;;  %1321 = vmatmul.mubr.bf16.gmra.mrb[56].mxu0 %v848_v2  ;;  %1434 = vmatmul.mubr.bf16.gmra.mrb[40].mxu1 %v850_v3 }
 0x1f4   :  { %v735_v10 = vpack.c.bf16 %v566_v8, %v562_v62  ;;  %v737_v11 = vpack.c.bf16 %v679_v9, %v675_v63 }
 0x1f5   :  { %v820_v12 = vadd.bf16 %v2201_v60, %v734_v6  ;;  %v822_v13 = vadd.bf16 %v2204_v61, %v736_v7 }
 0x1f6   :  { %v821_v14 = vadd.bf16 %v2207_v0, %v735_v10  ;;  %v823_v15 = vadd.bf16 %v2210_v1, %v737_v11 }
 0x1f7   :  { %v852_v22 = vmax.bf16 %v1994_v49, %v820_v12  ;;  %v854_v23 = vmax.bf16 %v1994_v49, %v822_v13 }
 0x1f8   :  { %v570_v16 = vpop.f32.mrb[16].mxu1  ;;  %v683_v17 = vpop.f32.mrb[32].mxu0  ;;  %v853_v18 = vmax.bf16 %v1994_v49, %v821_v14  ;;  %v855_v19 = vmax.bf16 %v1994_v49, %v823_v15 }
 0x1f9   :  { %v572_v20 = vpop.f32.mrb[17].mxu1  ;;  %v685_v21 = vpop.f32.mrb[33].mxu0 }
 0x1fa   :  { %v574_v24 = vpop.f32.mrb[18].mxu1  ;;  %v687_v25 = vpop.f32.mrb[34].mxu0  ;;  %1330 = vmatprep.mubr.bf16.mxu0 %v853_v18  ;;  %1443 = vmatprep.mubr.bf16.mxu1 %v855_v19 }
 0x1fb   :  { %v738_v26 = vpack.c.bf16 %v574_v24, %v570_v16  ;;  %v740_v27 = vpack.c.bf16 %v687_v25, %v683_v17  ;;  %v576_v28 = vpop.f32.mrb[19].mxu1  ;;  %v689_v29 = vpop.f32.mrb[35].mxu0  ;;  %1331 = vmatmul.mubr.bf16.gmra.mrb[60].mxu0 %v852_v22  ;;  %1444 = vmatmul.mubr.bf16.gmra.mrb[44].mxu1 %v854_v23 }
 0x1fc   :  { %v739_v59 = vpack.c.bf16 %v576_v28, %v572_v20  ;;  %v741_v30 = vpack.c.bf16 %v689_v29, %v685_v21 }
 0x1fd   :  { %v824_v31 = vadd.bf16 %v2201_v60, %v738_v26  ;;  %v826_v32 = vadd.bf16 %v2204_v61, %v740_v27 }
 0x1fe   :  { %v825_v33 = vadd.bf16 %v2207_v0, %v739_v59  ;;  %v827_v34 = vadd.bf16 %v2210_v1, %v741_v30 }
 0x1ff   :  { %v856_v42 = vmax.bf16 %v1994_v49, %v824_v31  ;;  %v858_v43 = vmax.bf16 %v1994_v49, %v826_v32 }
 0x200   :  { %v580_v35 = vpop.f32.mrb[20].mxu1  ;;  %v693_v36 = vpop.f32.mrb[36].mxu0  ;;  %v857_v37 = vmax.bf16 %v1994_v49, %v825_v33  ;;  %v859_v39 = vmax.bf16 %v1994_v49, %v827_v34 }
 0x201   :  { %v582_v40 = vpop.f32.mrb[21].mxu1  ;;  %v695_v41 = vpop.f32.mrb[37].mxu0 }
 0x202   :  { %v584_v44 = vpop.f32.mrb[22].mxu1  ;;  %v697_v45 = vpop.f32.mrb[38].mxu0  ;;  %1340 = vmatprep.mubr.bf16.mxu0 %v857_v37  ;;  %1453 = vmatprep.mubr.bf16.mxu1 %v859_v39 }
 0x203   :  { %v742_v46 = vpack.c.bf16 %v584_v44, %v580_v35  ;;  %v744_v47 = vpack.c.bf16 %v697_v45, %v693_v36  ;;  %v586_v48 = vpop.f32.mrb[23].mxu1  ;;  %v699_v50 = vpop.f32.mrb[39].mxu0  ;;  %1341 = vmatmul.mubr.bf16.gmra.mrb[64].mxu0 %v856_v42  ;;  %1454 = vmatmul.mubr.bf16.gmra.mrb[48].mxu1 %v858_v43 }
 0x204   :  { %v743_v51 = vpack.c.bf16 %v586_v48, %v582_v40  ;;  %v745_v52 = vpack.c.bf16 %v699_v50, %v695_v41 }
 0x205   :  { %v828_v53 = vadd.bf16 %v2201_v60, %v742_v46  ;;  %v830_v54 = vadd.bf16 %v2204_v61, %v744_v47 }
 0x206   :  { %v829_v56 = vadd.bf16 %v2207_v0, %v743_v51  ;;  %v831_v58 = vadd.bf16 %v2210_v1, %v745_v52 }
 0x207   :  { %v860_v6 = vmax.bf16 %v1994_v49, %v828_v53  ;;  %v862_v7 = vmax.bf16 %v1994_v49, %v830_v54 }
 0x208   :  { %v590_v62 = vpop.f32.mrb[24].mxu1  ;;  %v703_v63 = vpop.f32.mrb[40].mxu0  ;;  %v861_v2 = vmax.bf16 %v1994_v49, %v829_v56  ;;  %v863_v3 = vmax.bf16 %v1994_v49, %v831_v58 }
 0x209   :  { %v592_v4 = vpop.f32.mrb[25].mxu1  ;;  %v705_v5 = vpop.f32.mrb[41].mxu0 }
 0x20a   :  { %v594_v8 = vpop.f32.mrb[26].mxu1  ;;  %v707_v9 = vpop.f32.mrb[42].mxu0  ;;  %1350 = vmatprep.mubr.bf16.mxu0 %v861_v2  ;;  %1463 = vmatprep.mubr.bf16.mxu1 %v863_v3 }
 0x20b   :  { %v746_v10 = vpack.c.bf16 %v594_v8, %v590_v62  ;;  %v748_v11 = vpack.c.bf16 %v707_v9, %v703_v63  ;;  %v596_v12 = vpop.f32.mrb[27].mxu1  ;;  %v709_v13 = vpop.f32.mrb[43].mxu0  ;;  %1351 = vmatmul.mubr.bf16.gmra.mrb[68].mxu0 %v860_v6  ;;  %1464 = vmatmul.mubr.bf16.gmra.mrb[52].mxu1 %v862_v7 }
 0x20c   :  { %v747_v14 = vpack.c.bf16 %v596_v12, %v592_v4  ;;  %v749_v15 = vpack.c.bf16 %v709_v13, %v705_v5 }
 0x20d   :  { %v832_v16 = vadd.bf16 %v2201_v60, %v746_v10  ;;  %v834_v17 = vadd.bf16 %v2204_v61, %v748_v11 }
 0x20e   :  { %v833_v18 = vadd.bf16 %v2207_v0, %v747_v14  ;;  %v835_v19 = vadd.bf16 %v2210_v1, %v749_v15 }
 0x20f   :  { %v864_v26 = vmax.bf16 %v1994_v49, %v832_v16  ;;  %v866_v27 = vmax.bf16 %v1994_v49, %v834_v17 }
 0x210   :  { %v600_v20 = vpop.f32.mrb[28].mxu1  ;;  %v713_v21 = vpop.f32.mrb[44].mxu0  ;;  %v865_v22 = vmax.bf16 %v1994_v49, %v833_v18  ;;  %v867_v23 = vmax.bf16 %v1994_v49, %v835_v19 }
 0x211   :  { %v602_v24 = vpop.f32.mrb[29].mxu1  ;;  %v715_v25 = vpop.f32.mrb[45].mxu0 }
 0x212   :  { %v604_v28 = vpop.f32.mrb[30].mxu1  ;;  %v717_v29 = vpop.f32.mrb[46].mxu0  ;;  %1360 = vmatprep.mubr.bf16.mxu0 %v865_v22  ;;  %1473 = vmatprep.mubr.bf16.mxu1 %v867_v23 }
 0x213   :  { %v750_v59 = vpack.c.bf16 %v604_v28, %v600_v20  ;;  %v752_v30 = vpack.c.bf16 %v717_v29, %v713_v21  ;;  %v606_v31 = vpop.f32.mrb[31].mxu1  ;;  %v719_v32 = vpop.f32.mrb[47].mxu0  ;;  %1361 = vmatmul.mubr.bf16.gmra.mrb[72].mxu0 %v864_v26  ;;  %1474 = vmatmul.mubr.bf16.gmra.mrb[56].mxu1 %v866_v27 }
 0x214   :  { %v751_v33 = vpack.c.bf16 %v606_v31, %v602_v24  ;;  %v753_v34 = vpack.c.bf16 %v719_v32, %v715_v25 }
 0x215   :  { %v836_v35 = vadd.bf16 %v2201_v60, %v750_v59  ;;  %v838_v36 = vadd.bf16 %v2204_v61, %v752_v30  ;;  %v936_v60 = vld [vmem:[%s2339_s6] sm:$0x3]  ;;  %s1995_s6 = smov [#allocation7]  }
 0x216   :  { %v837_v37 = vadd.bf16 %v2207_v0, %v751_v33  ;;  %v839_v39 = vadd.bf16 %v2210_v1, %v753_v34  ;;  %v2280_v61 = vrot.slane %v936_v60, %v2138_v57  ;;  %v2284_v0 = vrot.slane %v936_v60, %v762_v38  ;;  %s1531_s18 = sshll.u32 %s1995_s6, 4  ;;  %s1532_s18 = int_to_ptr.vmem [resolvable:$true] %s1531_s18 }
 0x217   :  { %v868_v42 = vmax.bf16 %v1994_v49, %v836_v35  ;;  %v870_v43 = vmax.bf16 %v1994_v49, %v838_v36  ;;  %s1960_s19 = scalar_lea.vmem %s1532_s18, 4096  ;;  %p1965_p3 = scmp.lt.s32.totalorder %s1532_s18, %s1532_s18 }
 0x218   :  { %v869_v40 = vmax.bf16 %v1994_v49, %v837_v37  ;;  %v871_v41 = vmax.bf16 %v1994_v49, %v839_v39  ;;  %p1961_p2 = scmp.ne.s32.totalorder %s1532_s18, %s1960_s19  ;;  %p1966_p4 = scmp.lt.s32.totalorder %s1960_s19, %s1960_s19 }
 0x21a   :  { %1370 = vmatprep.mubr.bf16.mxu0 %v869_v40  ;;  %1483 = vmatprep.mubr.bf16.mxu1 %v871_v41  ;;  %p1967_p5 = por %p1966_p4, %p1965_p3 }
 0x21b   :  { %1371 = vmatmul.mubr.bf16.gmra.mrb[76].mxu0 %v868_v42  ;;  %1484 = vmatmul.mubr.bf16.gmra.mrb[60].mxu1 %v870_v43 }
 0x21c   :  { %p1968_p6 = pnand %p1967_p5, %p1961_p2 }
 0x2b6   :  { %v1302_v1 = vpop.f32.mrb[48].mxu0  ;;  %v1415_v44 = vpop.f32.mrb[32].mxu1 }
 0x2b7   :  { %v1303_v45 = vadd.f32 %v1302_v1, %v2280_v61  ;;  %v1304_v49 = vpop.f32.mrb[49].mxu0  ;;  %v1417_v46 = vpop.f32.mrb[33].mxu1 }
 0x2b8   :  { %v1305_v47 = vadd.f32 %v1304_v49, %v2284_v0  ;;  %v1306_v48 = vpop.f32.mrb[50].mxu0  ;;  %v1419_v50 = vpop.f32.mrb[34].mxu1 }
 0x2b9   :  { %v1416_v51 = vadd.f32 %v1415_v44, %v1303_v45  ;;  %v1307_v52 = vadd.f32 %v1306_v48, %v2280_v61  ;;  %v1308_v53 = vpop.f32.mrb[51].mxu0  ;;  %v1421_v57 = vpop.f32.mrb[35].mxu1 }
 0x2ba   :  { %v1418_v54 = vadd.f32 %v1417_v46, %v1305_v47  ;;  %v1309_v55 = vadd.f32 %v1308_v53, %v2284_v0 }
 0x2bb   :  { %1494 = vst [vmem:[#allocation7] sm:$0xff] %v1416_v51  ;;  %v1420_v38 = vadd.f32 %v1419_v50, %v1307_v52 }
 0x2bc   :  { %1495 = vst [vmem:[#allocation7 + $0x8] sm:$0xff] %v1418_v54  ;;  %v1422_v56 = vadd.f32 %v1421_v57, %v1309_v55 }
 0x2bd   :  { %1496 = vst [vmem:[#allocation7 + $0x10] sm:$0xff] %v1420_v38 }
 0x2be   :  { %1497 = vst [vmem:[#allocation7 + $0x18] sm:$0xff] %v1422_v56  ;;  %v1312_v58 = vpop.f32.mrb[52].mxu0  ;;  %v1425_v62 = vpop.f32.mrb[36].mxu1 }
 0x2bf   :  { %v1313_v63 = vadd.f32 %v1312_v58, %v2280_v61  ;;  %v1314_v2 = vpop.f32.mrb[53].mxu0  ;;  %v1427_v3 = vpop.f32.mrb[37].mxu1 }
 0x2c0   :  { %v1315_v4 = vadd.f32 %v1314_v2, %v2284_v0  ;;  %v1316_v5 = vpop.f32.mrb[54].mxu0  ;;  %v1429_v6 = vpop.f32.mrb[38].mxu1 }
 0x2c1   :  { %v1426_v7 = vadd.f32 %v1425_v62, %v1313_v63  ;;  %v1317_v8 = vadd.f32 %v1316_v5, %v2280_v61  ;;  %v1318_v9 = vpop.f32.mrb[55].mxu0  ;;  %v1431_v10 = vpop.f32.mrb[39].mxu1 }
 0x2c2   :  { %v1428_v11 = vadd.f32 %v1427_v3, %v1315_v4  ;;  %v1319_v12 = vadd.f32 %v1318_v9, %v2284_v0 }
 0x2c3   :  { %1498 = vst [vmem:[#allocation7 + $0x20] sm:$0xff] %v1426_v7  ;;  %v1430_v13 = vadd.f32 %v1429_v6, %v1317_v8 }
 0x2c4   :  { %1499 = vst [vmem:[#allocation7 + $0x28] sm:$0xff] %v1428_v11  ;;  %v1432_v14 = vadd.f32 %v1431_v10, %v1319_v12 }
 0x2c5   :  { %1500 = vst [vmem:[#allocation7 + $0x30] sm:$0xff] %v1430_v13 }
 0x2c6   :  { %1501 = vst [vmem:[#allocation7 + $0x38] sm:$0xff] %v1432_v14  ;;  %v1322_v15 = vpop.f32.mrb[56].mxu0  ;;  %v1435_v16 = vpop.f32.mrb[40].mxu1 }
 0x2c7   :  { %v1323_v17 = vadd.f32 %v1322_v15, %v2280_v61  ;;  %v1324_v18 = vpop.f32.mrb[57].mxu0  ;;  %v1437_v19 = vpop.f32.mrb[41].mxu1 }
 0x2c8   :  { %v1325_v20 = vadd.f32 %v1324_v18, %v2284_v0  ;;  %v1326_v21 = vpop.f32.mrb[58].mxu0  ;;  %v1439_v22 = vpop.f32.mrb[42].mxu1 }
 0x2c9   :  { %v1436_v23 = vadd.f32 %v1435_v16, %v1323_v17  ;;  %v1327_v24 = vadd.f32 %v1326_v21, %v2280_v61  ;;  %v1328_v25 = vpop.f32.mrb[59].mxu0  ;;  %v1441_v26 = vpop.f32.mrb[43].mxu1 }
 0x2ca   :  { %v1438_v27 = vadd.f32 %v1437_v19, %v1325_v20  ;;  %v1329_v28 = vadd.f32 %v1328_v25, %v2284_v0 }
 0x2cb   :  { %1502 = vst [vmem:[#allocation7 + $0x40] sm:$0xff] %v1436_v23  ;;  %v1440_v29 = vadd.f32 %v1439_v22, %v1327_v24 }
 0x2cc   :  { %1503 = vst [vmem:[#allocation7 + $0x48] sm:$0xff] %v1438_v27  ;;  %v1442_v59 = vadd.f32 %v1441_v26, %v1329_v28 }
 0x2cd   :  { %1504 = vst [vmem:[#allocation7 + $0x50] sm:$0xff] %v1440_v29 }
 0x2ce   :  { %1505 = vst [vmem:[#allocation7 + $0x58] sm:$0xff] %v1442_v59  ;;  %v1332_v30 = vpop.f32.mrb[60].mxu0  ;;  %v1445_v31 = vpop.f32.mrb[44].mxu1 }
 0x2cf   :  { %v1333_v32 = vadd.f32 %v1332_v30, %v2280_v61  ;;  %v1334_v33 = vpop.f32.mrb[61].mxu0  ;;  %v1447_v34 = vpop.f32.mrb[45].mxu1 }
 0x2d0   :  { %v1335_v35 = vadd.f32 %v1334_v33, %v2284_v0  ;;  %v1336_v36 = vpop.f32.mrb[62].mxu0  ;;  %v1449_v37 = vpop.f32.mrb[46].mxu1 }
 0x2d1   :  { %v1446_v39 = vadd.f32 %v1445_v31, %v1333_v32  ;;  %v1337_v40 = vadd.f32 %v1336_v36, %v2280_v61  ;;  %v1338_v41 = vpop.f32.mrb[63].mxu0  ;;  %v1451_v42 = vpop.f32.mrb[47].mxu1 }
 0x2d2   :  { %v1448_v43 = vadd.f32 %v1447_v34, %v1335_v35  ;;  %v1339_v60 = vadd.f32 %v1338_v41, %v2284_v0 }
 0x2d3   :  { %1506 = vst [vmem:[#allocation7 + $0x60] sm:$0xff] %v1446_v39  ;;  %v1450_v1 = vadd.f32 %v1449_v37, %v1337_v40 }
 0x2d4   :  { %1507 = vst [vmem:[#allocation7 + $0x68] sm:$0xff] %v1448_v43  ;;  %v1452_v44 = vadd.f32 %v1451_v42, %v1339_v60 }
 0x2d5   :  { %1508 = vst [vmem:[#allocation7 + $0x70] sm:$0xff] %v1450_v1 }
 0x2d6   :  { %1509 = vst [vmem:[#allocation7 + $0x78] sm:$0xff] %v1452_v44  ;;  %v1342_v45 = vpop.f32.mrb[64].mxu0  ;;  %v1455_v49 = vpop.f32.mrb[48].mxu1 }
 0x2d7   :  { %v1343_v46 = vadd.f32 %v1342_v45, %v2280_v61  ;;  %v1344_v47 = vpop.f32.mrb[65].mxu0  ;;  %v1457_v48 = vpop.f32.mrb[49].mxu1 }
 0x2d8   :  { %v1345_v50 = vadd.f32 %v1344_v47, %v2284_v0  ;;  %v1346_v51 = vpop.f32.mrb[66].mxu0  ;;  %v1459_v52 = vpop.f32.mrb[50].mxu1 }
 0x2d9   :  { %v1456_v53 = vadd.f32 %v1455_v49, %v1343_v46  ;;  %v1347_v57 = vadd.f32 %v1346_v51, %v2280_v61  ;;  %v1348_v54 = vpop.f32.mrb[67].mxu0  ;;  %v1461_v55 = vpop.f32.mrb[51].mxu1 }
 0x2da   :  { %v1458_v38 = vadd.f32 %v1457_v48, %v1345_v50  ;;  %v1349_v56 = vadd.f32 %v1348_v54, %v2284_v0 }
 0x2db   :  { %1510 = vst [vmem:[#allocation7 + $0x80] sm:$0xff] %v1456_v53  ;;  %v1460_v58 = vadd.f32 %v1459_v52, %v1347_v57 }
 0x2dc   :  { %1511 = vst [vmem:[#allocation7 + $0x88] sm:$0xff] %v1458_v38  ;;  %v1462_v62 = vadd.f32 %v1461_v55, %v1349_v56 }
 0x2dd   :  { %1512 = vst [vmem:[#allocation7 + $0x90] sm:$0xff] %v1460_v58 }
 0x2de   :  { %1513 = vst [vmem:[#allocation7 + $0x98] sm:$0xff] %v1462_v62  ;;  %v1352_v63 = vpop.f32.mrb[68].mxu0  ;;  %v1465_v2 = vpop.f32.mrb[52].mxu1 }
 0x2df   :  { %v1353_v3 = vadd.f32 %v1352_v63, %v2280_v61  ;;  %v1354_v4 = vpop.f32.mrb[69].mxu0  ;;  %v1467_v5 = vpop.f32.mrb[53].mxu1 }
 0x2e0   :  { %v1355_v6 = vadd.f32 %v1354_v4, %v2284_v0  ;;  %v1356_v7 = vpop.f32.mrb[70].mxu0  ;;  %v1469_v8 = vpop.f32.mrb[54].mxu1 }
 0x2e1   :  { %v1466_v9 = vadd.f32 %v1465_v2, %v1353_v3  ;;  %v1357_v10 = vadd.f32 %v1356_v7, %v2280_v61  ;;  %v1358_v11 = vpop.f32.mrb[71].mxu0  ;;  %v1471_v12 = vpop.f32.mrb[55].mxu1 }
 0x2e2   :  { %v1468_v13 = vadd.f32 %v1467_v5, %v1355_v6  ;;  %v1359_v14 = vadd.f32 %v1358_v11, %v2284_v0 }
 0x2e3   :  { %1514 = vst [vmem:[#allocation7 + $0xa0] sm:$0xff] %v1466_v9  ;;  %v1470_v15 = vadd.f32 %v1469_v8, %v1357_v10 }
 0x2e4   :  { %1515 = vst [vmem:[#allocation7 + $0xa8] sm:$0xff] %v1468_v13  ;;  %v1472_v16 = vadd.f32 %v1471_v12, %v1359_v14 }
 0x2e5   :  { %1516 = vst [vmem:[#allocation7 + $0xb0] sm:$0xff] %v1470_v15 }
 0x2e6   :  { %1517 = vst [vmem:[#allocation7 + $0xb8] sm:$0xff] %v1472_v16  ;;  %v1362_v17 = vpop.f32.mrb[72].mxu0  ;;  %v1475_v18 = vpop.f32.mrb[56].mxu1 }
 0x2e7   :  { %v1363_v19 = vadd.f32 %v1362_v17, %v2280_v61  ;;  %v1364_v20 = vpop.f32.mrb[73].mxu0  ;;  %v1477_v21 = vpop.f32.mrb[57].mxu1 }
 0x2e8   :  { %v1365_v22 = vadd.f32 %v1364_v20, %v2284_v0  ;;  %v1366_v23 = vpop.f32.mrb[74].mxu0  ;;  %v1479_v24 = vpop.f32.mrb[58].mxu1 }
 0x2e9   :  { %v1476_v25 = vadd.f32 %v1475_v18, %v1363_v19  ;;  %v1367_v26 = vadd.f32 %v1366_v23, %v2280_v61  ;;  %v1368_v27 = vpop.f32.mrb[75].mxu0  ;;  %v1481_v28 = vpop.f32.mrb[59].mxu1 }
 0x2ea   :  { %v1478_v29 = vadd.f32 %v1477_v21, %v1365_v22  ;;  %v1369_v59 = vadd.f32 %v1368_v27, %v2284_v0 }
 0x2eb   :  { %1518 = vst [vmem:[#allocation7 + $0xc0] sm:$0xff] %v1476_v25  ;;  %v1480_v30 = vadd.f32 %v1479_v24, %v1367_v26 }
 0x2ec   :  { %1519 = vst [vmem:[#allocation7 + $0xc8] sm:$0xff] %v1478_v29  ;;  %v1482_v31 = vadd.f32 %v1481_v28, %v1369_v59 }
 0x2ed   :  { %1520 = vst [vmem:[#allocation7 + $0xd0] sm:$0xff] %v1480_v30 }
 0x2ee   :  { %1521 = vst [vmem:[#allocation7 + $0xd8] sm:$0xff] %v1482_v31  ;;  %v1372_v32 = vpop.f32.mrb[76].mxu0  ;;  %v1485_v33 = vpop.f32.mrb[60].mxu1 }
 0x2ef   :  { %v1373_v34 = vadd.f32 %v1372_v32, %v2280_v61  ;;  %v1374_v35 = vpop.f32.mrb[77].mxu0  ;;  %v1487_v36 = vpop.f32.mrb[61].mxu1 }
 0x2f0   :  { %v1375_v37 = vadd.f32 %v1374_v35, %v2284_v0  ;;  %v1376_v39 = vpop.f32.mrb[78].mxu0  ;;  %v1489_v40 = vpop.f32.mrb[62].mxu1 }
 0x2f1   :  { %v1486_v41 = vadd.f32 %v1485_v33, %v1373_v34  ;;  %v1377_v42 = vadd.f32 %v1376_v39, %v2280_v61  ;;  %v1378_v43 = vpop.f32.mrb[79].mxu0  ;;  %v1491_v60 = vpop.f32.mrb[63].mxu1 }
 0x2f2   :  { %v1488_v1 = vadd.f32 %v1487_v36, %v1375_v37  ;;  %v1379_v44 = vadd.f32 %v1378_v43, %v2284_v0 }
 0x2f3   :  { %1522 = vst [vmem:[#allocation7 + $0xe0] sm:$0xff] %v1486_v41  ;;  %v1490_v45 = vadd.f32 %v1489_v40, %v1377_v42 }
 0x2f4   :  { %1523 = vst [vmem:[#allocation7 + $0xe8] sm:$0xff] %v1488_v1  ;;  %v1492_v49 = vadd.f32 %v1491_v60, %v1379_v44 }
 0x2f5   :  { %1524 = vst [vmem:[#allocation7 + $0xf0] sm:$0xff] %v1490_v45 }
 0x2f6   :  { %1525 = vst [vmem:[#allocation7 + $0xf8] sm:$0xff] %v1492_v49 }
 0x2f7   :  { %1971 = shalt.err (!%p1968_p6)
}
 0x2f8   :  { %s1972_s22 = scalar_lea.hbm %s2340_s7, 4096 }
 0x2f9   :  { %p1973_p7 = scmp.ne.s32.totalorder %s2340_s7, %s1972_s22  ;;  %p1976_p8 = scmp.lt.u32.totalorder %s1972_s22, %s2340_s7 }
 0x2fb   :  { %p1978_p9 = pnand %p1976_p8, %p1973_p7 }
 0x2fd   :  { %1981 = shalt.err (!%p1978_p9)
}
 0x2fe   :  { %1537 = dma.vmem_to_hbm [thread:$0]  %s1532_s18, 4096, %s2340_s7, [#allocation4], %s1989_s11, %s1989_s11, %s1990_s12  }
 0x2ff   :  { %1986 = dma.done.wait [#allocation4], 4096  }
 0x300   :  { %1987 = vsyncadd [#allocation4], 4294963200 }
 0x301   :  { %1541 = vsyncpa [#allocation3], 1 }
 0x302   :  { %1542 = vsyncpa [#allocation6], 1 }
 0x303   :  { %1543 = vsyncpa [#allocation4], 1 }

</bundles_post_ra>
